<compile_context>
chip_gen: v5e
topology: v5e:2x2
jax: 0.10.0
libtpu: 0.0.40
codegen_flags: <defaults>
</compile_context>

<pallas_src>
import jax
import jax.numpy as jnp
from jax.experimental import pallas as pl
from jax.experimental.pallas import tpu as pltpu

EPS = 1e-5


def _make_pointnet_kernel(B, N, K1, mxu_dtype):
    inv_n = 1.0 / float(B * N)

    def kernel(x_ref,
               w1_ref, g1_ref, be1_ref,
               w2_ref, g2_ref, be2_ref,
               w3_ref, g3_ref, be3_ref,
               out_ref):
        def layer(h, w_ref, g_ref, be_ref, relu, cast):
            # pointwise conv (kernel_size=1) == matmul over the channel dim.
            # Conv bias omitted: exactly cancelled by training-mode BN mean.
            w = w_ref[...]
            if cast:
                h = h.astype(mxu_dtype)
                w = w.astype(mxu_dtype)
            y = jnp.dot(h, w, preferred_element_type=jnp.float32)

            # Fused BatchNorm1d (training mode): single sum/sumsq sweep,
            # folded gamma/beta -> one scale/shift FMA.  Stats over
            # (batch, points) per channel; biased variance, eps=1e-5.
            s = jnp.sum(y, axis=0, keepdims=True)
            sq = jnp.sum(y * y, axis=0, keepdims=True)
            mu = s * inv_n
            var = jnp.maximum(sq * inv_n - mu * mu, 0.0)   # clamp: cancellation
            scale = g_ref[...] * jax.lax.rsqrt(var + EPS)
            shift = be_ref[...] - mu * scale
            y = y * scale + shift
            if relu:
                y = jnp.maximum(y, 0.0)
            return y

        h = x_ref[...]                                          # (B*N, 3)
        # layer 1: K=3 underfills the MXU but is cheap; keep f32 operands.
        h = layer(h, w1_ref, g1_ref, be1_ref, True, False)      # (B*N, 64)
        h = layer(h, w2_ref, g2_ref, be2_ref, True, True)       # (B*N, 128)
        h = layer(h, w3_ref, g3_ref, be3_ref, False, True)      # (B*N, K1)

        # torch.max over the points dim (dim=2 of (B, K1, N)) -> (B, K1):
        # one reshape + reduction + one store (no per-batch masked stores).
        out_ref[...] = jnp.max(h.reshape(B, N, K1), axis=1)

    return kernel


def pointnet_forward(x, params, mxu_dtype=jnp.float32):
    """x: (B, N, 3) float32. params: dict of weights. Returns (B, K1).

    Set mxu_dtype=jnp.bfloat16 on v6e/v7x for production sizes (f32 accumulate
    and f32 BN math are kept either way; on v5e keep f32 — no bf16 VPU/EUP).
    """
    B, N, C_in = x.shape
    assert C_in == 3
    K1 = params["w3"].shape[1]
    BN = B * N
    x2d = x.reshape(BN, 3)

    # VMEM footprint estimate: lane-padded f32 slabs resident at once
    # (x, h64, h128, hK1 + one temporary each for the larger layers).
    lane = lambda c: -(-c // 128) * 128
    per_point = 4 * (lane(3) + 2 * lane(64) + 2 * lane(128) + 2 * lane(K1))
    vmem_bytes = int(per_point * BN * 1.5) + (2 << 20)
    # Monolithic (grid-less) design: whole problem must be VMEM-resident.
    # Cap with headroom under v7x's 64 MiB physical VMEM.
    assert vmem_bytes <= (48 << 20), (
        "B*N too large for the VMEM-resident kernel; use the row-tiled "
        "two-phase-BN variant (see TODO at top of file).")
    vmem_limit = min(max(vmem_bytes, 4 << 20), 48 << 20)

    kernel = _make_pointnet_kernel(B, N, K1, mxu_dtype)
    vmem = pl.BlockSpec(memory_space=pltpu.MemorySpace.VMEM)

    args = (
        x2d,
        params["w1"], params["g1"], params["be1"],
        params["w2"], params["g2"], params["be2"],
        params["w3"], params["g3"], params["be3"],
    )
    return pl.pallas_call(
        kernel,
        out_shape=jax.ShapeDtypeStruct((B, K1), jnp.float32),
        in_specs=[vmem] * len(args),
        out_specs=vmem,
        compiler_params=pltpu.CompilerParams(vmem_limit_bytes=vmem_limit),
    )(*args)


def init_params(key, K1):
    """Deterministic synthetic parameters (conv weights folded to (Cin, Cout)).

    Conv biases are kept in the param dict (they exist in the PyTorch module
    and are used by the reference), but the kernel does not need them: they
    are cancelled by training-mode BN.
    """
    ks = jax.random.split(key, 6)

    def lin(k, cin, cout):
        return jax.random.normal(k, (cin, cout), jnp.float32) * (1.0 / jnp.sqrt(cin))

    kb = jax.random.split(ks[5], 6)
    return {
        "w1": lin(ks[0], 3, 64),    "b1": jax.random.normal(kb[0], (1, 64)) * 0.1,
        "g1": 1.0 + 0.1 * jax.random.normal(kb[1], (1, 64)),
        "be1": 0.1 * jax.random.normal(kb[2], (1, 64)),
        "w2": lin(ks[1], 64, 128),  "b2": 0.1 * jax.random.normal(kb[3], (1, 128)),
        "g2": 1.0 + 0.1 * jax.random.normal(ks[2], (1, 128)),
        "be2": 0.1 * jax.random.normal(kb[4], (1, 128)),
        "w3": lin(ks[3], 128, K1),  "b3": 0.1 * jax.random.normal(kb[5], (1, K1)),
        "g3": 1.0 + 0.1 * jax.random.normal(ks[4], (1, K1)),
        "be3": 0.1 * jnp.ones((1, K1), jnp.float32),
    }


def pointnet_ref(x, params):
    """Pure-JAX reference mirroring the PyTorch forward (training-mode BN),
    including the conv biases (which the BN mean subtraction cancels)."""
    B, N, _ = x.shape
    h = x.reshape(B * N, 3)

    def layer(h, w, b, g, be, relu):
        y = h @ w + b
        mu = jnp.mean(y, axis=0, keepdims=True)
        var = jnp.mean((y - mu) ** 2, axis=0, keepdims=True)
        y = (y - mu) / jnp.sqrt(var + EPS) * g + be
        return jnp.maximum(y, 0.0) if relu else y

    h = layer(h, params["w1"], params["b1"], params["g1"], params["be1"], True)
    h = layer(h, params["w2"], params["b2"], params["g2"], params["be2"], True)
    h = layer(h, params["w3"], params["b3"], params["g3"], params["be3"], False)
    return jnp.max(h.reshape(B, N, -1), axis=1)


if __name__ == "__main__":
    # K1 is a constructor arg of the module; pick 128 so the (B, K1) output is
    # lane-dense (review: avoids masked vst.msk partial stores).  N % 8 == 0
    # keeps the in-kernel (B*N, K1) -> (B, N, K1) reshape sublane-aligned.
    B, N, K1 = 2, 16, 128
    key = jax.random.PRNGKey(0)
    kx, kp = jax.random.split(key)
    x = jax.random.normal(kx, (B, N, 3), jnp.float32)
    params = init_params(kp, K1)

    out = pointnet_forward(x, params)
    out = jax.block_until_ready(out)

    ref = pointnet_ref(x, params)
    assert out.shape == (B, K1)
    assert jnp.allclose(out, ref, atol=1e-4, rtol=1e-4), "mismatch vs reference"
    print("KERNEL_OK")
</pallas_src>

<mosaic_0001>
module attributes {stable_mosaic.version = 11 : i64} {
  func.func @kernel(%arg0: memref<32x3xf32, #tpu.memory_space<vmem>>, %arg1: memref<3x64xf32, #tpu.memory_space<vmem>>, %arg2: memref<1x64xf32, #tpu.memory_space<vmem>>, %arg3: memref<1x64xf32, #tpu.memory_space<vmem>>, %arg4: memref<64x128xf32, #tpu.memory_space<vmem>>, %arg5: memref<1x128xf32, #tpu.memory_space<vmem>>, %arg6: memref<1x128xf32, #tpu.memory_space<vmem>>, %arg7: memref<128x128xf32, #tpu.memory_space<vmem>>, %arg8: memref<1x128xf32, #tpu.memory_space<vmem>>, %arg9: memref<1x128xf32, #tpu.memory_space<vmem>>, %arg10: memref<2x128xf32, #tpu.memory_space<vmem>>) attributes {dimension_semantics = [], scalar_prefetch = 0 : i64, scratch_operands = 0 : i64, tpu.core_type = #tpu.core_type<tc>} {
    %c0 = arith.constant 0 : index
    %c0_0 = arith.constant 0 : index
    %0 = vector.load %arg0[%c0, %c0_0] : memref<32x3xf32, #tpu.memory_space<vmem>>, vector<32x3xf32>
    %c0_1 = arith.constant 0 : index
    %c0_2 = arith.constant 0 : index
    %1 = vector.load %arg1[%c0_1, %c0_2] : memref<3x64xf32, #tpu.memory_space<vmem>>, vector<3x64xf32>
    %cst = arith.constant dense<0.000000e+00> : vector<32x64xf32>
    %2 = tpu.matmul %0, %1, %cst {dimension_numbers = #tpu.dot_dimension_numbers<[1], [0], [0], [1], [0, 0, 1, 1], [], []>} : vector<32x3xf32>, vector<3x64xf32>, vector<32x64xf32> -> vector<32x64xf32>
    %cst_3 = arith.constant dense<0.000000e+00> : vector<64xf32>
    %3 = vector.multi_reduction <add>, %2, %cst_3 [0] : vector<32x64xf32> to vector<64xf32>
    %4 = vector.shape_cast %3 : vector<64xf32> to vector<1x64xf32>
    %5 = arith.mulf %2, %2 : vector<32x64xf32>
    %cst_4 = arith.constant dense<0.000000e+00> : vector<64xf32>
    %6 = vector.multi_reduction <add>, %5, %cst_4 [0] : vector<32x64xf32> to vector<64xf32>
    %7 = vector.shape_cast %6 : vector<64xf32> to vector<1x64xf32>
    %cst_5 = arith.constant 3.125000e-02 : f32
    %8 = vector.broadcast %cst_5 : f32 to vector<1x64xf32>
    %9 = arith.mulf %4, %8 : vector<1x64xf32>
    %cst_6 = arith.constant 3.125000e-02 : f32
    %10 = vector.broadcast %cst_6 : f32 to vector<1x64xf32>
    %11 = arith.mulf %7, %10 : vector<1x64xf32>
    %12 = arith.mulf %9, %9 : vector<1x64xf32>
    %13 = arith.subf %11, %12 : vector<1x64xf32>
    %cst_7 = arith.constant 0.000000e+00 : f32
    %14 = vector.broadcast %cst_7 : f32 to vector<1x64xf32>
    %15 = arith.maximumf %13, %14 : vector<1x64xf32>
    %c0_8 = arith.constant 0 : index
    %c0_9 = arith.constant 0 : index
    %16 = vector.load %arg2[%c0_8, %c0_9] : memref<1x64xf32, #tpu.memory_space<vmem>>, vector<1x64xf32>
    %cst_10 = arith.constant 9.99999974E-6 : f32
    %17 = vector.broadcast %cst_10 : f32 to vector<1x64xf32>
    %18 = arith.addf %15, %17 : vector<1x64xf32>
    %19 = math.rsqrt %18 : vector<1x64xf32>
    %20 = arith.mulf %16, %19 : vector<1x64xf32>
    %c0_11 = arith.constant 0 : index
    %c0_12 = arith.constant 0 : index
    %21 = vector.load %arg3[%c0_11, %c0_12] : memref<1x64xf32, #tpu.memory_space<vmem>>, vector<1x64xf32>
    %22 = arith.mulf %9, %20 : vector<1x64xf32>
    %23 = arith.subf %21, %22 : vector<1x64xf32>
    %24 = vector.broadcast %20 : vector<1x64xf32> to vector<32x64xf32>
    %25 = arith.mulf %2, %24 : vector<32x64xf32>
    %26 = vector.broadcast %23 : vector<1x64xf32> to vector<32x64xf32>
    %27 = arith.addf %25, %26 : vector<32x64xf32>
    %cst_13 = arith.constant 0.000000e+00 : f32
    %28 = vector.broadcast %cst_13 : f32 to vector<32x64xf32>
    %29 = arith.maximumf %27, %28 : vector<32x64xf32>
    %c0_14 = arith.constant 0 : index
    %c0_15 = arith.constant 0 : index
    %30 = vector.load %arg4[%c0_14, %c0_15] : memref<64x128xf32, #tpu.memory_space<vmem>>, vector<64x128xf32>
    %cst_16 = arith.constant dense<0.000000e+00> : vector<32x128xf32>
    %31 = tpu.matmul %29, %30, %cst_16 {dimension_numbers = #tpu.dot_dimension_numbers<[1], [0], [0], [1], [0, 0, 1, 1], [], []>} : vector<32x64xf32>, vector<64x128xf32>, vector<32x128xf32> -> vector<32x128xf32>
    %cst_17 = arith.constant dense<0.000000e+00> : vector<128xf32>
    %32 = vector.multi_reduction <add>, %31, %cst_17 [0] : vector<32x128xf32> to vector<128xf32>
    %33 = vector.shape_cast %32 : vector<128xf32> to vector<1x128xf32>
    %34 = arith.mulf %31, %31 : vector<32x128xf32>
    %cst_18 = arith.constant dense<0.000000e+00> : vector<128xf32>
    %35 = vector.multi_reduction <add>, %34, %cst_18 [0] : vector<32x128xf32> to vector<128xf32>
    %36 = vector.shape_cast %35 : vector<128xf32> to vector<1x128xf32>
    %cst_19 = arith.constant 3.125000e-02 : f32
    %37 = vector.broadcast %cst_19 : f32 to vector<1x128xf32>
    %38 = arith.mulf %33, %37 : vector<1x128xf32>
    %cst_20 = arith.constant 3.125000e-02 : f32
    %39 = vector.broadcast %cst_20 : f32 to vector<1x128xf32>
    %40 = arith.mulf %36, %39 : vector<1x128xf32>
    %41 = arith.mulf %38, %38 : vector<1x128xf32>
    %42 = arith.subf %40, %41 : vector<1x128xf32>
    %cst_21 = arith.constant 0.000000e+00 : f32
    %43 = vector.broadcast %cst_21 : f32 to vector<1x128xf32>
    %44 = arith.maximumf %42, %43 : vector<1x128xf32>
    %c0_22 = arith.constant 0 : index
    %c0_23 = arith.constant 0 : index
    %45 = vector.load %arg5[%c0_22, %c0_23] : memref<1x128xf32, #tpu.memory_space<vmem>>, vector<1x128xf32>
    %cst_24 = arith.constant 9.99999974E-6 : f32
    %46 = vector.broadcast %cst_24 : f32 to vector<1x128xf32>
    %47 = arith.addf %44, %46 : vector<1x128xf32>
    %48 = math.rsqrt %47 : vector<1x128xf32>
    %49 = arith.mulf %45, %48 : vector<1x128xf32>
    %c0_25 = arith.constant 0 : index
    %c0_26 = arith.constant 0 : index
    %50 = vector.load %arg6[%c0_25, %c0_26] : memref<1x128xf32, #tpu.memory_space<vmem>>, vector<1x128xf32>
    %51 = arith.mulf %38, %49 : vector<1x128xf32>
    %52 = arith.subf %50, %51 : vector<1x128xf32>
    %53 = vector.broadcast %49 : vector<1x128xf32> to vector<32x128xf32>
    %54 = arith.mulf %31, %53 : vector<32x128xf32>
    %55 = vector.broadcast %52 : vector<1x128xf32> to vector<32x128xf32>
    %56 = arith.addf %54, %55 : vector<32x128xf32>
    %cst_27 = arith.constant 0.000000e+00 : f32
    %57 = vector.broadcast %cst_27 : f32 to vector<32x128xf32>
    %58 = arith.maximumf %56, %57 : vector<32x128xf32>
    %c0_28 = arith.constant 0 : index
    %c0_29 = arith.constant 0 : index
    %59 = vector.load %arg7[%c0_28, %c0_29] : memref<128x128xf32, #tpu.memory_space<vmem>>, vector<128x128xf32>
    %cst_30 = arith.constant dense<0.000000e+00> : vector<32x128xf32>
    %60 = tpu.matmul %58, %59, %cst_30 {dimension_numbers = #tpu.dot_dimension_numbers<[1], [0], [0], [1], [0, 0, 1, 1], [], []>} : vector<32x128xf32>, vector<128x128xf32>, vector<32x128xf32> -> vector<32x128xf32>
    %cst_31 = arith.constant dense<0.000000e+00> : vector<128xf32>
    %61 = vector.multi_reduction <add>, %60, %cst_31 [0] : vector<32x128xf32> to vector<128xf32>
    %62 = vector.shape_cast %61 : vector<128xf32> to vector<1x128xf32>
    %63 = arith.mulf %60, %60 : vector<32x128xf32>
    %cst_32 = arith.constant dense<0.000000e+00> : vector<128xf32>
    %64 = vector.multi_reduction <add>, %63, %cst_32 [0] : vector<32x128xf32> to vector<128xf32>
    %65 = vector.shape_cast %64 : vector<128xf32> to vector<1x128xf32>
    %cst_33 = arith.constant 3.125000e-02 : f32
    %66 = vector.broadcast %cst_33 : f32 to vector<1x128xf32>
    %67 = arith.mulf %62, %66 : vector<1x128xf32>
    %cst_34 = arith.constant 3.125000e-02 : f32
    %68 = vector.broadcast %cst_34 : f32 to vector<1x128xf32>
    %69 = arith.mulf %65, %68 : vector<1x128xf32>
    %70 = arith.mulf %67, %67 : vector<1x128xf32>
    %71 = arith.subf %69, %70 : vector<1x128xf32>
    %cst_35 = arith.constant 0.000000e+00 : f32
    %72 = vector.broadcast %cst_35 : f32 to vector<1x128xf32>
    %73 = arith.maximumf %71, %72 : vector<1x128xf32>
    %c0_36 = arith.constant 0 : index
    %c0_37 = arith.constant 0 : index
    %74 = vector.load %arg8[%c0_36, %c0_37] : memref<1x128xf32, #tpu.memory_space<vmem>>, vector<1x128xf32>
    %cst_38 = arith.constant 9.99999974E-6 : f32
    %75 = vector.broadcast %cst_38 : f32 to vector<1x128xf32>
    %76 = arith.addf %73, %75 : vector<1x128xf32>
    %77 = math.rsqrt %76 : vector<1x128xf32>
    %78 = arith.mulf %74, %77 : vector<1x128xf32>
    %c0_39 = arith.constant 0 : index
    %c0_40 = arith.constant 0 : index
    %79 = vector.load %arg9[%c0_39, %c0_40] : memref<1x128xf32, #tpu.memory_space<vmem>>, vector<1x128xf32>
    %80 = arith.mulf %67, %78 : vector<1x128xf32>
    %81 = arith.subf %79, %80 : vector<1x128xf32>
    %82 = vector.broadcast %78 : vector<1x128xf32> to vector<32x128xf32>
    %83 = arith.mulf %60, %82 : vector<32x128xf32>
    %84 = vector.broadcast %81 : vector<1x128xf32> to vector<32x128xf32>
    %85 = arith.addf %83, %84 : vector<32x128xf32>
    %86 = vector.shape_cast %85 : vector<32x128xf32> to vector<2x16x128xf32>
    %cst_41 = arith.constant dense<0xFF800000> : vector<2x128xf32>
    %87 = vector.multi_reduction <maximumf>, %86, %cst_41 [1] : vector<2x16x128xf32> to vector<2x128xf32>
    %c0_42 = arith.constant 0 : index
    %c0_43 = arith.constant 0 : index
    %88 = vector.load %arg10[%c0_42, %c0_43] : memref<2x128xf32, #tpu.memory_space<vmem>>, vector<2x128xf32>
    tpu.vector_store %arg10[%c0_42, %c0_43], %87 {strides = array<i32>} : memref<2x128xf32, #tpu.memory_space<vmem>>, vector<2x128xf32>,
    return
  }
}

</mosaic_0001>

<bundles_post_ra>
// kernel: tpu_custom_call.1
= control target key start
LH: loop header
LB: loop body
LE: loop exit
PB: predicated region body
PF: predicated region fallthrough
CT: control target
= control target key end

     0   :  { %15 = vsyncpa [#allocation3], 0  ;;  %s715_s0 = inlined_call_operand.vmem [shape: f32[32,3], index: 0, kind: input, shape index: {}]   ;;  %s716_s1 = inlined_call_operand.vmem [shape: f32[3,64], index: 1, kind: input, shape index: {}]   ;;  %s717_s2 = inlined_call_operand.vmem [shape: f32[1,64], index: 2, kind: input, shape index: {}]   ;;  %s718_s3 = inlined_call_operand.vmem [shape: f32[1,64], index: 3, kind: input, shape index: {}]   ;;  %s719_s4 = inlined_call_operand.hbm [shape: f32[64,128], index: 4, kind: input, shape index: {}]   ;;  %s720_s5 = inlined_call_operand.vmem [shape: f32[1,128], index: 5, kind: input, shape index: {}]   ;;  %s721_s6 = inlined_call_operand.vmem [shape: f32[1,128], index: 6, kind: input, shape index: {}]   ;;  %s722_s7 = inlined_call_operand.hbm [shape: f32[128,128], index: 7, kind: input, shape index: {}]   ;;  %s723_s8 = inlined_call_operand.vmem [shape: f32[1,128], index: 8, kind: input, shape index: {}]   ;;  %s724_s9 = inlined_call_operand.vmem [shape: f32[1,128], index: 9, kind: input, shape index: {}]   ;;  %s725_s10 = inlined_call_operand.hbm [shape: f32[2,128], index: 10, kind: output, shape index: {}]  }
   0x1   :  { %16 = vsyncpa [#allocation6], 0 }
   0x2   :  { %17 = vsyncpa [#allocation4], 0  ;;  %s30_s15 = sshll.u32 %s719_s4, 4  ;;  %s553_s16 = smov [#allocation2]   ;;  %s31_s15 = int_to_ptr.hbm [resolvable:$true] %s30_s15 }
   0x3   :  { %s32_s17 = sshll.u32 %s553_s16, 4  ;;  %s47_s20 = sshll.u32 %s722_s7, 4  ;;  %s33_s17 = int_to_ptr.vmem [resolvable:$true] %s32_s17  ;;  %s48_s20 = int_to_ptr.hbm [resolvable:$true] %s47_s20 }
   0x4   :  { %s554_s21 = smov 128   ;;  %s555_s22 = smov 8  }
   0x5   :  { %38 = dma.hbm_to_vmem [thread:$0]  %s31_s15, 1024, %s33_s17, [#allocation3], %s554_s21, %s554_s21, %s555_s22  }
   0x6   :  { %s556_s23 = smov [#allocation5]  }
   0x7   :  { %s49_s24 = sshll.u32 %s556_s23, 4  ;;  %s50_s24 = int_to_ptr.vmem [resolvable:$true] %s49_s24 }
   0x8   :  { %55 = dma.hbm_to_vmem [thread:$0]  %s48_s20, 2048, %s50_s24, [#allocation6], %s554_s21, %s554_s21, %s555_s22  }
   0x9   :  { %547 = dma.done.wait [#allocation3], 1024  }
   0xa   :  { %548 = vsyncadd [#allocation3], 4294966272 }
   0xb   :  { %549 = dma.done.wait [#allocation6], 2048  }
   0xc   :  { %550 = vsyncadd [#allocation6], 4294965248  ;;  %vm86_vm0 = vcmask 1042432   ;;  %vm73_vm1 = vcmask 23552   ;;  %v72_v0 = vld [vmem:[%s716_s1] sm:$0x7] }
   0xd   :  { %v68_v1 = vld [vmem:[%s715_s0] sm:$0xff]  ;;  %439 = vmatpush.msk.msra.mxu0 %vm86_vm0, %v72_v0  ;;  %v69_v2 = vld [vmem:[%s715_s0 + $0x8] sm:$0xff]  ;;  %v70_v3 = vld [vmem:[%s715_s0 + $0x10] sm:$0xff]  ;;  %vm119_vm2 = vcmask 523264   ;;  %s428_s21 = sshll.u32 %s725_s10, 4  ;;  %vm417_vm12 = vcmask 1041409   ;;  %s429_s21 = int_to_ptr.hbm [resolvable:$true] %s428_s21 }
   0xe   :  { %440 = vmatmul.msk.f32.vlgmr.msra.gmra.mxu0 %vm73_vm1, %v68_v1  ;;  %v71_v4 = vld [vmem:[%s715_s0 + $0x18] sm:$0xff]  ;;  %v195_v35 = vld [vmem:[#allocation2 + $0x30] sm:$0xff]  ;;  %v194_v38 = vld [vmem:[#allocation2 + $0x28] sm:$0xff] }
   0xf   :  { %v196_v32 = vld [vmem:[#allocation2 + $0x38] sm:$0xff]  ;;  %v193_v41 = vld [vmem:[#allocation2 + $0x20] sm:$0xff]  ;;  %v191_v47 = vld [vmem:[#allocation2 + $0x10] sm:$0xff] }
  0x10   :  { %217 = vmatpush.msra.mxu1 %v196_v32  ;;  %v192_v44 = vld [vmem:[#allocation2 + $0x18] sm:$0xff]  ;;  %v190_v49 = vld [vmem:[#allocation2 + $0x8] sm:$0xff]  ;;  %v189_v50 = vld [vmem:[#allocation2] sm:$0xff] }
  0x11   :  { %v155_v58 = vld [vmem:[%s717_s2] sm:$0x1] }
  0x12   :  { %218 = vmatpush.msra.mxu1 %v195_v35  ;;  %v168_v62 = vld [vmem:[%s718_s3] sm:$0x1] }
  0x14   :  { %219 = vmatpush.msra.mxu1 %v194_v38 }
  0x16   :  { %441 = vmatmul.msk.f32.gmra.mxu0 %vm73_vm1, %v69_v2  ;;  %220 = vmatpush.msra.mxu1 %v193_v41 }
  0x18   :  { %221 = vmatpush.msra.mxu1 %v192_v44 }
  0x1a   :  { %222 = vmatpush.msra.mxu1 %v191_v47 }
  0x1c   :  { %223 = vmatpush.msra.mxu1 %v190_v49 }
  0x1e   :  { %442 = vmatmul.msk.f32.gmra.mxu0 %vm73_vm1, %v70_v3  ;;  %224 = vmatpush.msra.mxu1 %v189_v50 }
  0x26   :  { %443 = vmatmul.msk.f32.gmra.mxu0 %vm73_vm1, %v71_v4 }
  0x8b   :  { %v634_v5 = vpop.f32.mrf.mxu0 }
  0x8c   :  { %v133_v9 = vmul.f32 %v634_v5, %v634_v5  ;;  %v120_v12 = vsel %vm119_vm2, %v634_v5, 0.0 }
  0x8e   :  { %v137_v16 = vsel %vm119_vm2, %v133_v9, 0.0 }
  0x93   :  { %v636_v6 = vpop.f32.mrf.mxu0 }
  0x94   :  { %v134_v8 = vmul.f32 %v636_v6, %v636_v6  ;;  %v121_v10 = vsel %vm119_vm2, %v636_v6, 0.0 }
  0x95   :  { %v122_v15 = vadd.f32 %v121_v10, %v120_v12 }
  0x96   :  { %v138_v13 = vsel %vm119_vm2, %v134_v8, 0.0 }
  0x97   :  { %v139_v18 = vadd.f32 %v138_v13, %v137_v16 }
  0x9b   :  { %v638_v7 = vpop.f32.mrf.mxu0 }
  0x9c   :  { %v135_v11 = vmul.f32 %v638_v7, %v638_v7  ;;  %v123_v14 = vsel %vm119_vm2, %v638_v7, 0.0 }
  0x9d   :  { %v124_v19 = vadd.f32 %v123_v14, %v122_v15 }
  0x9e   :  { %v140_v17 = vsel %vm119_vm2, %v135_v11, 0.0 }
  0x9f   :  { %v141_v23 = vadd.f32 %v140_v17, %v139_v18 }
  0xa3   :  { %v655_v20 = vpop.f32.mrf.mxu0 }
  0xa4   :  { %v125_v21 = vsel %vm119_vm2, %v655_v20, 0.0  ;;  %v136_v22 = vmul.f32 %v655_v20, %v655_v20 }
  0xa5   :  { %v126_v24 = vadd.f32 %v125_v21, %v124_v19  ;;  %v314_v19 = vld [vmem:[#allocation5 + $0x78] sm:$0xff] }
  0xa6   :  { %v142_v25 = vsel %vm119_vm2, %v136_v22, 0.0  ;;  %315 = vmatpush.msra.mxu2 %v314_v19  ;;  %448 = vmatpush.msra.mxu3 %v314_v19 }
  0xa7   :  { %v127_v26 = vrot.slane %v126_v24, 4  ;;  %v143_v27 = vadd.f32 %v142_v25, %v141_v23  ;;  %v311_v25 = vld [vmem:[#allocation5 + $0x60] sm:$0xff] }
  0xa9   :  { %v128_v28 = vadd.f32 %v127_v26, %v126_v24  ;;  %v144_v29 = vrot.slane %v143_v27, 4 }
  0xab   :  { %v129_v30 = vrot.slane %v128_v28, 2  ;;  %v145_v31 = vadd.f32 %v144_v29, %v143_v27  ;;  %v310_v29 = vld [vmem:[#allocation5 + $0x58] sm:$0xff] }
  0xad   :  { %v130_v33 = vadd.f32 %v129_v30, %v128_v28  ;;  %v146_v34 = vrot.slane %v145_v31, 2 }
  0xaf   :  { %v131_v36 = vrot.slane %v130_v33, 1  ;;  %v147_v37 = vadd.f32 %v146_v34, %v145_v31 }
  0xb1   :  { %v132_v39 = vadd.f32 %v131_v36, %v130_v33  ;;  %v148_v40 = vrot.slane %v147_v37, 1  ;;  %v309_v33 = vld [vmem:[#allocation5 + $0x50] sm:$0xff]  ;;  %v308_v36 = vld [vmem:[#allocation5 + $0x48] sm:$0xff] }
  0xb3   :  { %v149_v42 = vadd.f32 %v148_v40, %v147_v37  ;;  %v150_v43 = vmul.f32 0.03125, %v132_v39  ;;  %v307_v39 = vld [vmem:[#allocation5 + $0x40] sm:$0xff] }
  0xb5   :  { %v151_v45 = vmul.f32 0.03125, %v149_v42  ;;  %v152_v46 = vmul.f32 %v150_v43, %v150_v43  ;;  %v306_v42 = vld [vmem:[#allocation5 + $0x38] sm:$0xff] }
  0xb7   :  { %v153_v48 = vsub.f32 %v151_v45, %v152_v46  ;;  %v305_v45 = vld [vmem:[#allocation5 + $0x30] sm:$0xff] }
  0xb9   :  { %v154_v51 = vmax.f32 %v153_v48, 0.0  ;;  %v304_v48 = vld [vmem:[#allocation5 + $0x28] sm:$0xff] }
  0xbb   :  { %v156_v52 = vadd.f32 1e-05, %v154_v51  ;;  %v303_v51 = vld [vmem:[#allocation5 + $0x20] sm:$0xff] }
  0xbd   :  { %469 = vrsqrt.f32 %v156_v52  ;;  %vm163_vm4 = vweird.f32 %v156_v52 }
  0xc3   :  { %v470_v53 = vpop.eup %469 }
  0xc4   :  { %v158_v54 = vmul.f32 %v470_v53, %v156_v52  ;;  %vm164_vm3 = vweird.f32 %v470_v53 }
  0xc5   :  { %vm165_vm5 = vmor %vm163_vm4, %vm164_vm3 }
  0xc6   :  { %v159_v55 = vmul.f32 %v470_v53, %v158_v54  ;;  %v302_v54 = vld [vmem:[#allocation5 + $0x18] sm:$0xff] }
  0xc8   :  { %v160_v56 = vmul.f32 0.5, %v159_v55  ;;  %v301_v55 = vld [vmem:[#allocation5 + $0x10] sm:$0xff] }
  0xca   :  { %v161_v57 = vsub.f32 1.5, %v160_v56 }
  0xcc   :  { %v162_v59 = vmul.f32 %v470_v53, %v161_v57 }
  0xce   :  { %v166_v60 = vsel %vm165_vm5, %v470_v53, %v162_v59 }
  0xcf   :  { %v167_v61 = vmul.f32 %v166_v60, %v155_v58  ;;  %v300_v58 = vld [vmem:[#allocation5 + $0x8] sm:$0xff]  ;;  %v299_v60 = vld [vmem:[#allocation5] sm:$0xff] }
  0xd1   :  { %v169_v63 = vmul.f32 %v167_v61, %v150_v43  ;;  %v172_v0 = vperm.slane %v167_v61, 0 }
  0xd3   :  { %v170_v1 = vsub.f32 %v168_v62, %v169_v63  ;;  %v174_v3 = vmul.f32 %v172_v0, %v634_v5  ;;  %v175_v9 = vmul.f32 %v172_v0, %v636_v6  ;;  %v176_v12 = vmul.f32 %v172_v0, %v638_v7  ;;  %v313_v7 = vld [vmem:[#allocation5 + $0x70] sm:$0xff] }
  0xd4   :  { %v177_v15 = vmul.f32 %v172_v0, %v655_v20  ;;  %316 = vmatpush.msra.mxu2 %v313_v7  ;;  %449 = vmatpush.msra.mxu3 %v313_v7  ;;  %v312_v20 = vld [vmem:[#allocation5 + $0x68] sm:$0xff] }
  0xd5   :  { %v179_v2 = vperm.slane %v170_v1, 0 }
  0xd6   :  { %317 = vmatpush.msra.mxu2 %v312_v20  ;;  %450 = vmatpush.msra.mxu3 %v312_v20 }
  0xd7   :  { %v181_v4 = vadd.f32 %v179_v2, %v174_v3  ;;  %v182_v10 = vadd.f32 %v179_v2, %v175_v9  ;;  %v183_v13 = vadd.f32 %v179_v2, %v176_v12  ;;  %v184_v16 = vadd.f32 %v179_v2, %v177_v15 }
  0xd8   :  { %318 = vmatpush.msra.mxu2 %v311_v25  ;;  %451 = vmatpush.msra.mxu3 %v311_v25 }
  0xd9   :  { %v185_v8 = vmax.f32 %v181_v4, 0.0  ;;  %v186_v11 = vmax.f32 %v182_v10, 0.0  ;;  %v187_v14 = vmax.f32 %v183_v13, 0.0  ;;  %v188_v5 = vmax.f32 %v184_v16, 0.0  ;;  %v265_v4 = vld [vmem:[%s720_s5] sm:$0x1] }
  0xda   :  { %319 = vmatpush.msra.mxu2 %v310_v29  ;;  %452 = vmatpush.msra.mxu3 %v310_v29 }
  0xdb   :  { %444 = vmatmul.msk.f32.vlgmr.msra.gmra.mxu1 %vm119_vm2, %v185_v8 }
  0xdc   :  { %320 = vmatpush.msra.mxu2 %v309_v33  ;;  %453 = vmatpush.msra.mxu3 %v309_v33 }
  0xde   :  { %321 = vmatpush.msra.mxu2 %v308_v36  ;;  %454 = vmatpush.msra.mxu3 %v308_v36 }
  0xe0   :  { %322 = vmatpush.msra.mxu2 %v307_v39  ;;  %455 = vmatpush.msra.mxu3 %v307_v39 }
  0xe2   :  { %323 = vmatpush.msra.mxu2 %v306_v42  ;;  %456 = vmatpush.msra.mxu3 %v306_v42 }
  0xe3   :  { %445 = vmatmul.msk.f32.gmra.mxu1 %vm119_vm2, %v186_v11  ;;  %v278_v11 = vld [vmem:[%s721_s6] sm:$0x1] }
  0xe4   :  { %324 = vmatpush.msra.mxu2 %v305_v45  ;;  %457 = vmatpush.msra.mxu3 %v305_v45 }
  0xe6   :  { %325 = vmatpush.msra.mxu2 %v304_v48  ;;  %458 = vmatpush.msra.mxu3 %v304_v48 }
  0xe8   :  { %326 = vmatpush.msra.mxu2 %v303_v51  ;;  %459 = vmatpush.msra.mxu3 %v303_v51 }
  0xea   :  { %327 = vmatpush.msra.mxu2 %v302_v54  ;;  %460 = vmatpush.msra.mxu3 %v302_v54 }
  0xeb   :  { %446 = vmatmul.msk.f32.gmra.mxu1 %vm119_vm2, %v187_v14 }
  0xec   :  { %328 = vmatpush.msra.mxu2 %v301_v55  ;;  %461 = vmatpush.msra.mxu3 %v301_v55 }
  0xee   :  { %329 = vmatpush.msra.mxu2 %v300_v58  ;;  %462 = vmatpush.msra.mxu3 %v300_v58 }
  0xf0   :  { %330 = vmatpush.msra.mxu2 %v299_v60  ;;  %463 = vmatpush.msra.mxu3 %v299_v60 }
  0xf3   :  { %447 = vmatmul.msk.f32.gmra.mxu1 %vm119_vm2, %v188_v5 }
 0x158   :  { %v676_v17 = vpop.f32.mrf.mxu1 }
 0x159   :  { %v247_v22 = vmul.f32 %v676_v17, %v676_v17 }
 0x160   :  { %v678_v18 = vpop.f32.mrf.mxu1 }
 0x161   :  { %v248_v21 = vmul.f32 %v678_v18, %v678_v18  ;;  %v238_v23 = vadd.f32 %v678_v18, %v676_v17 }
 0x163   :  { %v251_v26 = vadd.f32 %v248_v21, %v247_v22 }
 0x168   :  { %v680_v6 = vpop.f32.mrf.mxu1 }
 0x169   :  { %v249_v24 = vmul.f32 %v680_v6, %v680_v6  ;;  %v239_v27 = vadd.f32 %v238_v23, %v680_v6 }
 0x16b   :  { %v252_v30 = vadd.f32 %v251_v26, %v249_v24 }
 0x170   :  { %v691_v28 = vpop.f32.mrf.mxu1 }
 0x171   :  { %v240_v31 = vadd.f32 %v239_v27, %v691_v28  ;;  %v250_v32 = vmul.f32 %v691_v28, %v691_v28 }
 0x173   :  { %v241_v34 = vrot.slane %v240_v31, 4  ;;  %v253_v35 = vadd.f32 %v252_v30, %v250_v32 }
 0x175   :  { %v242_v37 = vadd.f32 %v241_v34, %v240_v31  ;;  %v254_v38 = vrot.slane %v253_v35, 4 }
 0x177   :  { %v243_v40 = vrot.slane %v242_v37, 2  ;;  %v255_v41 = vadd.f32 %v254_v38, %v253_v35 }
 0x179   :  { %v244_v43 = vadd.f32 %v243_v40, %v242_v37  ;;  %v256_v44 = vrot.slane %v255_v41, 2 }
 0x17b   :  { %v245_v46 = vrot.slane %v244_v43, 1  ;;  %v257_v47 = vadd.f32 %v256_v44, %v255_v41 }
 0x17d   :  { %v246_v49 = vadd.f32 %v245_v46, %v244_v43  ;;  %v258_v50 = vrot.slane %v257_v47, 1 }
 0x17f   :  { %v259_v52 = vadd.f32 %v258_v50, %v257_v47  ;;  %v260_v53 = vmul.f32 0.03125, %v246_v49 }
 0x181   :  { %v261_v56 = vmul.f32 0.03125, %v259_v52  ;;  %v262_v57 = vmul.f32 %v260_v53, %v260_v53 }
 0x183   :  { %v263_v59 = vsub.f32 %v261_v56, %v262_v57 }
 0x185   :  { %v264_v61 = vmax.f32 %v263_v59, 0.0 }
 0x187   :  { %v266_v62 = vadd.f32 1e-05, %v264_v61 }
 0x189   :  { %471 = vrsqrt.f32 %v266_v62  ;;  %vm273_vm7 = vweird.f32 %v266_v62 }
 0x18f   :  { %v472_v63 = vpop.eup %471 }
 0x190   :  { %v268_v0 = vmul.f32 %v472_v63, %v266_v62  ;;  %vm274_vm6 = vweird.f32 %v472_v63  ;;  %v371_v62 = vld [vmem:[%s723_s8] sm:$0x1]  ;;  %s557_s8 = smov [#allocation7]  }
 0x191   :  { %vm275_vm8 = vmor %vm273_vm7, %vm274_vm6 }
 0x192   :  { %v269_v1 = vmul.f32 %v472_v63, %v268_v0 }
 0x194   :  { %v270_v2 = vmul.f32 0.5, %v269_v1 }
 0x196   :  { %v271_v3 = vsub.f32 1.5, %v270_v2  ;;  %v384_v2 = vld [vmem:[%s724_s9] sm:$0x1]  ;;  %s426_s9 = sshll.u32 %s557_s8, 4  ;;  %s427_s9 = int_to_ptr.vmem [resolvable:$true] %s426_s9 }
 0x198   :  { %v272_v8 = vmul.f32 %v472_v63, %v271_v3 }
 0x19a   :  { %v276_v9 = vsel %vm275_vm8, %v472_v63, %v272_v8 }
 0x19b   :  { %v277_v10 = vmul.f32 %v276_v9, %v265_v4 }
 0x19d   :  { %v279_v12 = vmul.f32 %v277_v10, %v260_v53  ;;  %v282_v13 = vperm.slane %v277_v10, 0 }
 0x19f   :  { %v280_v14 = vsub.f32 %v278_v11, %v279_v12  ;;  %v284_v15 = vmul.f32 %v282_v13, %v676_v17  ;;  %v286_v5 = vmul.f32 %v282_v13, %v680_v6  ;;  %v287_v22 = vmul.f32 %v282_v13, %v691_v28 }
 0x1a0   :  { %v285_v23 = vmul.f32 %v282_v13, %v678_v18 }
 0x1a1   :  { %v289_v16 = vperm.slane %v280_v14, 0 }
 0x1a3   :  { %v291_v19 = vadd.f32 %v289_v16, %v284_v15  ;;  %v293_v7 = vadd.f32 %v289_v16, %v286_v5  ;;  %v292_v24 = vadd.f32 %v289_v16, %v285_v23  ;;  %v294_v25 = vadd.f32 %v289_v16, %v287_v22 }
 0x1a5   :  { %v295_v21 = vmax.f32 %v291_v19, 0.0  ;;  %v297_v20 = vmax.f32 %v293_v7, 0.0  ;;  %v296_v26 = vmax.f32 %v292_v24, 0.0  ;;  %v298_v27 = vmax.f32 %v294_v25, 0.0 }
 0x1a7   :  { %331 = vmatmul.f32.vlgmr.msra.gmra.mxu2 %v295_v21  ;;  %337 = vmatmul.f32.vlgmr.msra.gmra.mxu3 %v297_v20 }
 0x1af   :  { %334 = vmatmul.f32.gmra.mxu2 %v296_v26  ;;  %340 = vmatmul.f32.gmra.mxu3 %v298_v27 }
 0x22a   :  { %v332_v17 = vpop.f32.mrf.mxu2  ;;  %v338_v29 = vpop.f32.mrf.mxu3 }
 0x22b   :  { %v353_v6 = vmul.f32 %v332_v17, %v332_v17  ;;  %v355_v34 = vmul.f32 %v338_v29, %v338_v29 }
 0x232   :  { %v335_v30 = vpop.f32.mrf.mxu2  ;;  %v341_v33 = vpop.f32.mrf.mxu3 }
 0x233   :  { %v344_v31 = vadd.f32 %v335_v30, %v332_v17  ;;  %v354_v32 = vmul.f32 %v335_v30, %v335_v30  ;;  %v356_v37 = vmul.f32 %v341_v33, %v341_v33 }
 0x235   :  { %v357_v35 = vadd.f32 %v354_v32, %v353_v6  ;;  %v345_v28 = vadd.f32 %v344_v31, %v338_v29 }
 0x237   :  { %v346_v36 = vadd.f32 %v345_v28, %v341_v33  ;;  %v358_v38 = vadd.f32 %v357_v35, %v355_v34 }
 0x239   :  { %v347_v18 = vrot.slane %v346_v36, 4  ;;  %v359_v39 = vadd.f32 %v358_v38, %v356_v37 }
 0x23b   :  { %v348_v40 = vadd.f32 %v347_v18, %v346_v36  ;;  %v360_v41 = vrot.slane %v359_v39, 4 }
 0x23d   :  { %v349_v42 = vrot.slane %v348_v40, 2  ;;  %v361_v43 = vadd.f32 %v360_v41, %v359_v39 }
 0x23f   :  { %v350_v44 = vadd.f32 %v349_v42, %v348_v40  ;;  %v362_v45 = vrot.slane %v361_v43, 2 }
 0x241   :  { %v351_v46 = vrot.slane %v350_v44, 1  ;;  %v363_v47 = vadd.f32 %v362_v45, %v361_v43 }
 0x243   :  { %v352_v48 = vadd.f32 %v351_v46, %v350_v44  ;;  %v364_v49 = vrot.slane %v363_v47, 1 }
 0x245   :  { %v365_v50 = vadd.f32 %v364_v49, %v363_v47  ;;  %v366_v51 = vmul.f32 0.03125, %v352_v48 }
 0x247   :  { %v367_v52 = vmul.f32 0.03125, %v365_v50  ;;  %v368_v53 = vmul.f32 %v366_v51, %v366_v51 }
 0x249   :  { %v369_v54 = vsub.f32 %v367_v52, %v368_v53 }
 0x24b   :  { %v370_v55 = vmax.f32 %v369_v54, 0.0 }
 0x24d   :  { %v372_v56 = vadd.f32 1e-05, %v370_v55 }
 0x24f   :  { %473 = vrsqrt.f32 %v372_v56  ;;  %vm379_vm10 = vweird.f32 %v372_v56 }
 0x255   :  { %v474_v57 = vpop.eup %473 }
 0x256   :  { %v374_v58 = vmul.f32 %v474_v57, %v372_v56  ;;  %vm380_vm9 = vweird.f32 %v474_v57 }
 0x257   :  { %vm381_vm11 = vmor %vm379_vm10, %vm380_vm9 }
 0x258   :  { %v375_v59 = vmul.f32 %v474_v57, %v374_v58 }
 0x25a   :  { %v376_v60 = vmul.f32 0.5, %v375_v59 }
 0x25c   :  { %v377_v61 = vsub.f32 1.5, %v376_v60 }
 0x25e   :  { %v378_v63 = vmul.f32 %v474_v57, %v377_v61 }
 0x260   :  { %v382_v0 = vsel %vm381_vm11, %v474_v57, %v378_v63 }
 0x261   :  { %v383_v1 = vmul.f32 %v382_v0, %v371_v62 }
 0x263   :  { %v385_v3 = vmul.f32 %v383_v1, %v366_v51  ;;  %v388_v4 = vperm.slane %v383_v1, 0 }
 0x265   :  { %v386_v8 = vsub.f32 %v384_v2, %v385_v3  ;;  %v390_v9 = vmul.f32 %v388_v4, %v332_v17  ;;  %v391_v10 = vmul.f32 %v388_v4, %v335_v30  ;;  %v392_v11 = vmul.f32 %v388_v4, %v338_v29 }
 0x266   :  { %v393_v12 = vmul.f32 %v388_v4, %v341_v33 }
 0x267   :  { %v395_v13 = vperm.slane %v386_v8, 0 }
 0x269   :  { %v399_v14 = vadd.f32 %v395_v13, %v392_v11  ;;  %v400_v15 = vadd.f32 %v395_v13, %v393_v12  ;;  %v397_v16 = vadd.f32 %v395_v13, %v390_v9  ;;  %v398_v5 = vadd.f32 %v395_v13, %v391_v10 }
 0x26b   :  { %v408_v19 = vmax.f32 %v399_v14, %v400_v15  ;;  %v401_v7 = vmax.f32 %v397_v16, %v398_v5 }
 0x26d   :  { %v409_v21 = vrot.slane %v408_v19, 4  ;;  %v402_v20 = vrot.slane %v401_v7, 4 }
 0x26f   :  { %v410_v22 = vmax.f32 %v408_v19, %v409_v21  ;;  %v403_v23 = vmax.f32 %v401_v7, %v402_v20 }
 0x271   :  { %v411_v24 = vrot.slane %v410_v22, 2  ;;  %v404_v25 = vrot.slane %v403_v23, 2 }
 0x273   :  { %v412_v26 = vmax.f32 %v410_v22, %v411_v24  ;;  %v405_v27 = vmax.f32 %v403_v23, %v404_v25 }
 0x275   :  { %v406_v6 = vrot.slane %v405_v27, 1  ;;  %v413_v17 = vrot.slane %v412_v26, 1 }
 0x277   :  { %v407_v29 = vmax.f32 %v405_v27, %v406_v6  ;;  %v414_v30 = vmax.f32 %v412_v26, %v413_v17 }
 0x279   :  { %v418_v31 = vsel %vm417_vm12, %v414_v30, %v407_v29 }
 0x27a   :  { %420 = vst [vmem:[#allocation7] sm:$0x3] %v418_v31 }
 0x27b   :  { %431 = dma.vmem_to_hbm [thread:$0]  %s427_s9, 32, %s429_s21, [#allocation4]  }
 0x27c   :  { %551 = dma.done.wait [#allocation4], 32  }
 0x27d   :  { %552 = vsyncadd [#allocation4], 4294967264 }
 0x27e   :  { %436 = vsyncpa [#allocation3], 1 }
 0x27f   :  { %437 = vsyncpa [#allocation6], 1 }
 0x280   :  { %438 = vsyncpa [#allocation4], 1 }

</bundles_post_ra>
